<compile_context>
chip_gen: v5e
topology: v5e:2x2
jax: 0.10.0
libtpu: 0.0.40
codegen_flags: <defaults>
</compile_context>

<pallas_src>
import jax
import jax.numpy as jnp
from jax.experimental import pallas as pl
from jax.experimental.pallas import tpu as pltpu


N_PAD = 128  # lane-dense padded width of the out_proj layer


def _round_up(x, m):
    return ((x + m - 1) // m) * m


def _head_kernel(x_ref, w1_ref, b1_ref, w2_ref, b2_ref, w3_ref, b3_ref, o_ref):
    # x arrives already in bf16 (cast fused into the wrapper's CLS slice);
    # every matmul accumulates in f32 on the MXU.
    x = x_ref[...]                                      # [TB, H] bf16

    # dropout (identity in eval) -> dense -> tanh
    h1 = jnp.dot(x, w1_ref[...], preferred_element_type=jnp.float32) + b1_ref[...]
    h1 = jnp.tanh(h1)                                   # EUP, free under DMA/MXU bound

    # dropout (identity) -> dense2 -> tanh
    h2 = jnp.dot(h1.astype(jnp.bfloat16), w2_ref[...],
                 preferred_element_type=jnp.float32) + b2_ref[...]
    h2 = jnp.tanh(h2)

    # dropout (identity) -> out_proj (zero-padded to 128 lanes -> unmasked vst)
    out = jnp.dot(h2.astype(jnp.bfloat16), w3_ref[...],
                  preferred_element_type=jnp.float32) + b3_ref[...]
    o_ref[...] = out.astype(o_ref.dtype)                # bf16 writeback


def roberta_classification_head(features, params, n_cls=2, block_b=512):
    """features: [B, S, H] float32; params: output of prepare_params()."""
    # CLS slice + bf16 cast fused into a single pass over the activations.
    x = features[:, 0, :].astype(jnp.bfloat16)          # [B, H] bf16
    B, H = x.shape
    L2 = params["w2"].shape[1]                          # H // 2
    N3 = params["w3"].shape[1]                          # padded out width (128)

    # Minimal padding: only up to the sublane multiple of 8 (<= 7 extra rows).
    B8 = _round_up(B, 8)
    if B8 != B:
        x = jnp.pad(x, ((0, B8 - B), (0, 0)))

    # Large batch tile (weights are resident, so bigger tiles only cost
    # 2*TB*H*2 bytes of x buffering); ragged last tile handled by cdiv grid.
    TB = min(block_b, B8)
    n_blocks = pl.cdiv(B8, TB)

    # Tight, computed VMEM budget (~2x footprint) instead of a blanket cap.
    weight_bytes = (
        2 * (params["w1"].size + params["w2"].size + params["w3"].size)
        + 4 * (params["b1"].size + params["b2"].size + params["b3"].size)
    )
    stream_bytes = 2 * TB * H * 2 + 2 * TB * N3 * 2     # double-buffered bf16 x / out tiles
    vmem_bytes = int(min(64 << 20, max(4 << 20, 2 * (weight_bytes + stream_bytes))))

    # Advisory cost estimate so XLA schedules the encoder around this kernel.
    cost = pl.CostEstimate(
        flops=2 * B8 * (H * H + H * L2 + L2 * N3),
        transcendentals=B8 * (H + L2),
        bytes_accessed=weight_bytes + B8 * H * 2 + B8 * N3 * 2,
    )

    const = lambda i: (0, 0)

    def resident(shape):
        # Fetched once (constant index_map) and held single-buffered.
        return pl.BlockSpec(shape, const, pipeline_mode=pl.Buffered(1))

    out = pl.pallas_call(
        _head_kernel,
        out_shape=jax.ShapeDtypeStruct((B8, N3), jnp.bfloat16),
        grid=(n_blocks,),
        in_specs=[
            pl.BlockSpec((TB, H), lambda i: (i, 0)),    # x tile (bf16), streamed per step
            resident((H, H)),                           # w1 (bf16)
            resident((1, H)),                           # b1 (f32)
            resident((H, L2)),                          # w2 (bf16)
            resident((1, L2)),                          # b2 (f32)
            resident((L2, N3)),                         # w3 (bf16, lane-padded)
            resident((1, N3)),                          # b3 (f32, lane-padded)
        ],
        out_specs=pl.BlockSpec((TB, N3), lambda i: (i, 0)),
        compiler_params=pltpu.CompilerParams(
            dimension_semantics=("parallel",),          # v7x: split batch over 2 TCs
            vmem_limit_bytes=vmem_bytes,
        ),
        cost_estimate=cost,
    )(
        x,
        params["w1"], params["b1"],
        params["w2"], params["b2"],
        params["w3"], params["b3"],
    )
    # Slice the real logits back out and restore f32.
    return out[:B, :n_cls].astype(jnp.float32)


def prepare_params(params, n_pad=N_PAD):
    """One-time prep: bf16 weights (f32 MXU accumulation), out_proj padded to
    n_pad lanes so the final matmul / store are lane-dense."""
    l2n, n_cls = params["w3"].shape
    w3p = jnp.zeros((l2n, n_pad), jnp.float32).at[:, :n_cls].set(params["w3"])
    b3p = jnp.zeros((1, n_pad), jnp.float32).at[:, :n_cls].set(params["b3"])
    return {
        "w1": params["w1"].astype(jnp.bfloat16),
        "b1": params["b1"].astype(jnp.float32),
        "w2": params["w2"].astype(jnp.bfloat16),
        "b2": params["b2"].astype(jnp.float32),
        "w3": w3p.astype(jnp.bfloat16),
        "b3": b3p.astype(jnp.float32),
    }


def init_params(key, hidden_size):
    """Deterministic synthetic parameters matching the module's shapes.

    PyTorch nn.Linear stores weight as [out, in]; we store the transpose
    [in, out] so the kernel does x @ W + b.  Biases kept 2-D ([1, out]).
    """
    l2n = hidden_size // 2
    k1, k2, k3, k4, k5, k6 = jax.random.split(key, 6)
    return {
        "w1": (0.1 * jax.random.normal(k1, (hidden_size, hidden_size))).astype(jnp.float32),
        "b1": (0.1 * jax.random.normal(k2, (1, hidden_size))).astype(jnp.float32),
        "w2": (0.1 * jax.random.normal(k3, (hidden_size, l2n))).astype(jnp.float32),
        "b2": (0.1 * jax.random.normal(k4, (1, l2n))).astype(jnp.float32),
        "w3": (0.1 * jax.random.normal(k5, (l2n, 2))).astype(jnp.float32),
        "b3": (0.1 * jax.random.normal(k6, (1, 2))).astype(jnp.float32),
    }


def _reference(features, params_f32):
    """Pure-JAX f32 reference (module semantics in eval mode)."""
    x = features[:, 0, :]
    x = jnp.tanh(x @ params_f32["w1"] + params_f32["b1"])
    x = jnp.tanh(x @ params_f32["w2"] + params_f32["b2"])
    return x @ params_f32["w3"] + params_f32["b3"]


if __name__ == "__main__":
    # Small shapes: batch=2, seq=8, hidden=32  (config.hidden_size = 32)
    B, S, H = 2, 8, 32
    key = jax.random.PRNGKey(0)
    k_feat, k_params = jax.random.split(key)

    features = jax.random.normal(k_feat, (B, S, H), dtype=jnp.float32)
    params_f32 = init_params(k_params, H)
    params = prepare_params(params_f32)

    out = roberta_classification_head(features, params)
    out = jax.block_until_ready(out)

    ref = _reference(features, params_f32)
    assert out.shape == (B, 2)
    # bf16 weights/activations/logit writeback with f32 accumulation:
    # loosened tolerance.
    assert jnp.allclose(out, ref, atol=3e-2, rtol=3e-2), "mismatch vs reference"

    print("KERNEL_OK")
</pallas_src>

<mosaic_0001>
module attributes {stable_mosaic.version = 11 : i64} {
  func.func @_head_kernel(%arg0: i32, %arg1: memref<8x32xbf16, #tpu.memory_space<vmem>>, %arg2: memref<32x32xbf16, #tpu.memory_space<vmem>>, %arg3: memref<1x32xf32, #tpu.memory_space<vmem>>, %arg4: memref<32x16xbf16, #tpu.memory_space<vmem>>, %arg5: memref<1x16xf32, #tpu.memory_space<vmem>>, %arg6: memref<16x128xbf16, #tpu.memory_space<vmem>>, %arg7: memref<1x128xf32, #tpu.memory_space<vmem>>, %arg8: memref<8x128xbf16, #tpu.memory_space<vmem>>) attributes {dimension_semantics = [#tpu.dimension_semantics<parallel>], iteration_bounds = array<i64: 1>, scalar_prefetch = 0 : i64, scratch_operands = 0 : i64, tpu.core_type = #tpu.core_type<tc>, window_params = [{transform_indices = @transform_0, window_bounds = array<i64: 8, 32>}, {pipeline_mode = #tpu.pipeline_mode<synchronous>, transform_indices = @transform_1, window_bounds = array<i64: 32, 32>}, {pipeline_mode = #tpu.pipeline_mode<synchronous>, transform_indices = @transform_2, window_bounds = array<i64: 1, 32>}, {pipeline_mode = #tpu.pipeline_mode<synchronous>, transform_indices = @transform_3, window_bounds = array<i64: 32, 16>}, {pipeline_mode = #tpu.pipeline_mode<synchronous>, transform_indices = @transform_4, window_bounds = array<i64: 1, 16>}, {pipeline_mode = #tpu.pipeline_mode<synchronous>, transform_indices = @transform_5, window_bounds = array<i64: 16, 128>}, {pipeline_mode = #tpu.pipeline_mode<synchronous>, transform_indices = @transform_6, window_bounds = array<i64: 1, 128>}, {transform_indices = @transform_7, window_bounds = array<i64: 8, 128>}]} {
    %c0 = arith.constant 0 : index
    %c0_0 = arith.constant 0 : index
    %0 = vector.load %arg1[%c0, %c0_0] : memref<8x32xbf16, #tpu.memory_space<vmem>>, vector<8x32xbf16>
    %c0_1 = arith.constant 0 : index
    %c0_2 = arith.constant 0 : index
    %1 = vector.load %arg2[%c0_1, %c0_2] : memref<32x32xbf16, #tpu.memory_space<vmem>>, vector<32x32xbf16>
    %cst = arith.constant dense<0.000000e+00> : vector<8x32xf32>
    %2 = tpu.matmul %0, %1, %cst {dimension_numbers = #tpu.dot_dimension_numbers<[1], [0], [0], [1], [0, 0, 1, 1], [], []>} : vector<8x32xbf16>, vector<32x32xbf16>, vector<8x32xf32> -> vector<8x32xf32>
    %c0_3 = arith.constant 0 : index
    %c0_4 = arith.constant 0 : index
    %3 = vector.load %arg3[%c0_3, %c0_4] : memref<1x32xf32, #tpu.memory_space<vmem>>, vector<1x32xf32>
    %4 = vector.broadcast %3 : vector<1x32xf32> to vector<8x32xf32>
    %5 = arith.addf %2, %4 : vector<8x32xf32>
    %6 = math.tanh %5 : vector<8x32xf32>
    %7 = arith.truncf %6 : vector<8x32xf32> to vector<8x32xbf16>
    %c0_5 = arith.constant 0 : index
    %c0_6 = arith.constant 0 : index
    %8 = vector.load %arg4[%c0_5, %c0_6] : memref<32x16xbf16, #tpu.memory_space<vmem>>, vector<32x16xbf16>
    %cst_7 = arith.constant dense<0.000000e+00> : vector<8x16xf32>
    %9 = tpu.matmul %7, %8, %cst_7 {dimension_numbers = #tpu.dot_dimension_numbers<[1], [0], [0], [1], [0, 0, 1, 1], [], []>} : vector<8x32xbf16>, vector<32x16xbf16>, vector<8x16xf32> -> vector<8x16xf32>
    %c0_8 = arith.constant 0 : index
    %c0_9 = arith.constant 0 : index
    %10 = vector.load %arg5[%c0_8, %c0_9] : memref<1x16xf32, #tpu.memory_space<vmem>>, vector<1x16xf32>
    %11 = vector.broadcast %10 : vector<1x16xf32> to vector<8x16xf32>
    %12 = arith.addf %9, %11 : vector<8x16xf32>
    %13 = math.tanh %12 : vector<8x16xf32>
    %14 = arith.truncf %13 : vector<8x16xf32> to vector<8x16xbf16>
    %c0_10 = arith.constant 0 : index
    %c0_11 = arith.constant 0 : index
    %15 = vector.load %arg6[%c0_10, %c0_11] : memref<16x128xbf16, #tpu.memory_space<vmem>>, vector<16x128xbf16>
    %cst_12 = arith.constant dense<0.000000e+00> : vector<8x128xf32>
    %16 = tpu.matmul %14, %15, %cst_12 {dimension_numbers = #tpu.dot_dimension_numbers<[1], [0], [0], [1], [0, 0, 1, 1], [], []>} : vector<8x16xbf16>, vector<16x128xbf16>, vector<8x128xf32> -> vector<8x128xf32>
    %c0_13 = arith.constant 0 : index
    %c0_14 = arith.constant 0 : index
    %17 = vector.load %arg7[%c0_13, %c0_14] : memref<1x128xf32, #tpu.memory_space<vmem>>, vector<1x128xf32>
    %18 = vector.broadcast %17 : vector<1x128xf32> to vector<8x128xf32>
    %19 = arith.addf %16, %18 : vector<8x128xf32>
    %20 = arith.truncf %19 : vector<8x128xf32> to vector<8x128xbf16>
    %c0_15 = arith.constant 0 : index
    %c0_16 = arith.constant 0 : index
    %21 = vector.load %arg8[%c0_15, %c0_16] : memref<8x128xbf16, #tpu.memory_space<vmem>>, vector<8x128xbf16>
    tpu.vector_store %arg8[%c0_15, %c0_16], %20 {strides = array<i32>} : memref<8x128xbf16, #tpu.memory_space<vmem>>, vector<8x128xbf16>,
    return
  }
  func.func @transform_0(%arg0: i32) -> (i32, i32) {
    %c0_i32 = arith.constant 0 : i32
    %c0_i32_0 = arith.constant 0 : i32
    return %arg0, %c0_i32 : i32, i32
  }
  func.func @transform_1(%arg0: i32) -> (i32, i32) {
    %c0_i32 = arith.constant 0 : i32
    %c0_i32_0 = arith.constant 0 : i32
    %c0_i32_1 = arith.constant 0 : i32
    return %c0_i32, %c0_i32_0 : i32, i32
  }
  func.func @transform_2(%arg0: i32) -> (i32, i32) {
    %c0_i32 = arith.constant 0 : i32
    %c0_i32_0 = arith.constant 0 : i32
    %c0_i32_1 = arith.constant 0 : i32
    return %c0_i32, %c0_i32_0 : i32, i32
  }
  func.func @transform_3(%arg0: i32) -> (i32, i32) {
    %c0_i32 = arith.constant 0 : i32
    %c0_i32_0 = arith.constant 0 : i32
    %c0_i32_1 = arith.constant 0 : i32
    return %c0_i32, %c0_i32_0 : i32, i32
  }
  func.func @transform_4(%arg0: i32) -> (i32, i32) {
    %c0_i32 = arith.constant 0 : i32
    %c0_i32_0 = arith.constant 0 : i32
    %c0_i32_1 = arith.constant 0 : i32
    return %c0_i32, %c0_i32_0 : i32, i32
  }
  func.func @transform_5(%arg0: i32) -> (i32, i32) {
    %c0_i32 = arith.constant 0 : i32
    %c0_i32_0 = arith.constant 0 : i32
    %c0_i32_1 = arith.constant 0 : i32
    return %c0_i32, %c0_i32_0 : i32, i32
  }
  func.func @transform_6(%arg0: i32) -> (i32, i32) {
    %c0_i32 = arith.constant 0 : i32
    %c0_i32_0 = arith.constant 0 : i32
    %c0_i32_1 = arith.constant 0 : i32
    return %c0_i32, %c0_i32_0 : i32, i32
  }
  func.func @transform_7(%arg0: i32) -> (i32, i32) {
    %c0_i32 = arith.constant 0 : i32
    %c0_i32_0 = arith.constant 0 : i32
    return %arg0, %c0_i32 : i32, i32
  }
}

</mosaic_0001>

<bundles_post_ra>
// kernel: tpu_custom_call.1
= control target key start
LH: loop header
LB: loop body
LE: loop exit
PB: predicated region body
PF: predicated region fallthrough
CT: control target
= control target key end

     0   :  { %12 = vsyncpa [#allocation3], 0  ;;  %s329_s0 = inlined_call_operand.hbm [shape: bf16[8,32], index: 0, kind: input, shape index: {}]   ;;  %s330_s1 = inlined_call_operand.vmem [shape: bf16[32,32], index: 1, kind: input, shape index: {}]   ;;  %s331_s2 = inlined_call_operand.vmem [shape: f32[1,32], index: 2, kind: input, shape index: {}]   ;;  %s332_s3 = inlined_call_operand.vmem [shape: bf16[32,16], index: 3, kind: input, shape index: {}]   ;;  %s333_s4 = inlined_call_operand.vmem [shape: f32[1,16], index: 4, kind: input, shape index: {}]   ;;  %s334_s5 = inlined_call_operand.vmem [shape: bf16[16,128], index: 5, kind: input, shape index: {}]   ;;  %s335_s6 = inlined_call_operand.vmem [shape: f32[1,128], index: 6, kind: input, shape index: {}]   ;;  %s336_s7 = inlined_call_operand.hbm [shape: bf16[8,128], index: 7, kind: output, shape index: {}]  }
   0x1   :  { %13 = vsyncpa [#allocation4], 0  ;;  %s19_s26 = sshll.u32 %s329_s0, 4  ;;  %s257_s27 = smov [#allocation2]   ;;  %s20_s26 = int_to_ptr.hbm [resolvable:$true] %s19_s26 }
   0x2   :  { %s21_s28 = sshll.u32 %s257_s27, 4  ;;  %s22_s28 = int_to_ptr.vmem [resolvable:$true] %s21_s28 }
   0x3   :  { %24 = dma.hbm_to_vmem [thread:$0]  %s20_s26, 64, %s22_s28, [#allocation3]  }
   0x4   :  { %253 = dma.done.wait [#allocation3], 64  }
   0x5   :  { %254 = vsyncadd [#allocation3], 4294967232  ;;  %v192_v0 = vld [vmem:[%s330_s1 + $0x8] sm:$0xff]  ;;  %v191_v1 = vld [vmem:[%s330_s1] sm:$0xff]  ;;  %vm63_vm0 = vcmask 261120   ;;  %vm132_vm1 = vcmask 130048  }
   0x6   :  { %73 = vmatpush.bf16.msra.mxu0 %v192_v0  ;;  %v42_v2 = vld [vmem:[#allocation2] sm:$0xf]  ;;  %v194_v3 = vld [vmem:[%s332_s3 + $0x8] sm:$0xff]  ;;  %s258_s18 = smov [#allocation5]   ;;  %s158_s21 = sshll.u32 %s336_s7, 4  ;;  %s159_s21 = int_to_ptr.hbm [resolvable:$true] %s158_s21 }
   0x7   :  { %111 = vmatpush.bf16.msra.mxu1 %v194_v3  ;;  %v193_v4 = vld [vmem:[%s332_s3] sm:$0xff] }
   0x8   :  { %v198_v5 = vld [vmem:[%s331_s2] ss:$0 sm:$0xff] }
   0x9   :  { %v195_v11 = vld [vmem:[%s334_s5] sm:$0xff]  ;;  %s156_s5 = sshll.u32 %s258_s18, 4  ;;  %s157_s5 = int_to_ptr.vmem [resolvable:$true] %s156_s5 }
   0xa   :  { %74 = vmatpush.bf16.msra.mxu0 %v191_v1  ;;  %143 = vmatpush.bf16.msra.mxu2 %v195_v11  ;;  %v199_v12 = vld [vmem:[%s333_s4] ss:$0 sm:$0xff] }
   0xb   :  { %112 = vmatpush.bf16.msra.mxu1 %v193_v4  ;;  %v200_v18 = vld [vmem:[%s335_s6] ss:$0 sm:$0xff] }
   0xd   :  { %176 = vmatmul.msk.bf16.vlgmr.msra.gmra.mxu0 %vm63_vm0, %v42_v2 }
  0x8a   :  { %v76_v6 = vpop.f32.mrf.mxu0 }
  0x8b   :  { %v77_v7 = vadd.f32 %v198_v5, %v76_v6 }
  0x8d   :  { %201 = vtanh.f32 %v77_v7 }
  0x92   :  { %v78_v8 = vpop.f32.mrf.mxu0 }
  0x93   :  { %v202_v9 = vpop.eup %201 }
  0x94   :  { %v81_v10 = vpack.c.bf16 %v202_v9, %v202_v9 }
  0x96   :  { %185 = vmatmul.msk.bf16.vlgmr.msra.gmra.mxu1 %vm63_vm0, %v81_v10 }
 0x113   :  { %v114_v13 = vpop.f32.mrf.mxu1 }
 0x114   :  { %v115_v14 = vadd.f32 %v199_v12, %v114_v13 }
 0x116   :  { %203 = vtanh.f32 %v115_v14 }
 0x11b   :  { %v116_v15 = vpop.f32.mrf.mxu1 }
 0x11c   :  { %v204_v16 = vpop.eup %203 }
 0x11d   :  { %v119_v17 = vpack.c.bf16 %v204_v16, %v204_v16 }
 0x11f   :  { %190 = vmatmul.msk.bf16.vlgmr.msra.gmra.mxu2 %vm132_vm1, %v119_v17 }
 0x1a2   :  { %v145_v19 = vpop.f32.mrf.mxu2 }
 0x1a3   :  { %v146_v20 = vadd.f32 %v200_v18, %v145_v19 }
 0x1a5   :  { %v149_v21 = vpack.c.bf16 %v146_v20, %v146_v20 }
 0x1a7   :  { %150 = vst [vmem:[#allocation5] sm:$0xf] %v149_v21 }
 0x1a8   :  { %161 = dma.vmem_to_hbm [thread:$0]  %s157_s5, 64, %s159_s21, [#allocation4]  }
 0x1aa   :  { %v147_v22 = vpop.f32.mrf.mxu2 }
 0x1ab   :  { %255 = dma.done.wait [#allocation4], 64  }
 0x1ac   :  { %256 = vsyncadd [#allocation4], 4294967232 }
 0x1ad   :  { %166 = vsyncpa [#allocation3], 1 }
 0x1ae   :  { %167 = vsyncpa [#allocation4], 1 }

</bundles_post_ra>
